<compile_context>
chip_gen: v7x
topology: tpu7x:2x2x1
jax: 0.10.0
libtpu: 0.0.40
codegen_flags: <defaults>
</compile_context>

<pallas_src>
import numpy as np
import jax
import jax.numpy as jnp
from jax.experimental import pallas as pl
from jax.experimental.pallas import tpu as pltpu


def _spd_increase_dim_kernel(x_ref, et_ref, add_ref, o_ref):
    # x_ref  : (Lb, n, n)  block of SPD matrices (batch dims flattened)
    # et_ref : (n, m)      eye^T, resident across grid steps
    # add_ref: (m, m)      add,   resident across grid steps
    # o_ref  : (Lb, m, m)
    Lb, n, _ = x_ref.shape
    m = o_ref.shape[-1]
    Et = et_ref[...]                                             # (n, m)

    # T = X @ E^T with the batch folded into the MXU row dimension.
    X = x_ref[...].reshape(Lb * n, n)                            # lane dim unchanged
    T = jnp.dot(X, Et, preferred_element_type=jnp.float32)       # (Lb*n, m)

    # E @ X @ E^T = (X @ E^T)^T @ E^T  (X symmetric)  -> second folded matmul.
    Tt = jnp.swapaxes(T.reshape(Lb, n, m), -1, -2)               # (Lb, m, n)
    O = jnp.dot(Tt.reshape(Lb * m, n), Et,
                preferred_element_type=jnp.float32)              # (Lb*m, m)

    o_ref[...] = O.reshape(Lb, m, m) + add_ref[...]              # broadcast add


def spd_increase_dim(x, eye, add):
    """output = add + eye @ x @ eye.T for x of shape (*, n, n)."""
    *lead, n, _n2 = x.shape
    m, n_in = eye.shape
    assert n_in == n and _n2 == n
    L = int(np.prod(lead)) if lead else 1
    xf = x.reshape(L, n, n).astype(jnp.float32)

    # Whole problem fits in VMEM; keep 2 "parallel" grid steps when possible so
    # both v7x TensorCores are used (on v5e/v6e this is still only 2 steps).
    g = 2 if (L >= 2 and L % 2 == 0) else 1
    Lb = L // g

    out = pl.pallas_call(
        _spd_increase_dim_kernel,
        grid_spec=pltpu.PrefetchScalarGridSpec(
            num_scalar_prefetch=0,
            grid=(g,),
            in_specs=[
                pl.BlockSpec((Lb, n, n), lambda i: (i, 0, 0)),   # per-step slab
                pl.BlockSpec((n, m), lambda i: (0, 0)),          # eye^T (fetched once)
                pl.BlockSpec((m, m), lambda i: (0, 0)),          # add   (fetched once)
            ],
            out_specs=pl.BlockSpec((Lb, m, m), lambda i: (i, 0, 0)),
        ),
        out_shape=jax.ShapeDtypeStruct((L, m, m), jnp.float32),
        compiler_params=pltpu.CompilerParams(
            dimension_semantics=("parallel",)),
    )(xf, eye.T.astype(jnp.float32), add.astype(jnp.float32))
    return out.reshape(*lead, m, m)


if __name__ == "__main__":
    # Small shapes: batch=2, q=4 SPD matrices per sample, n=16 -> m=32.
    B, q, n, m = 2, 4, 16, 32
    key = jax.random.PRNGKey(0)

    # Deterministic SPD inputs, layout (B, q, n, n) == PyTorch (*, n, n).
    A = jax.random.normal(key, (B, q, n, n), jnp.float32)
    X = jnp.einsum('bqij,bqkj->bqik', A, A) / n + jnp.eye(n, dtype=jnp.float32)

    # Module buffers exactly as SPDIncreaseDim.__init__ builds them.
    eye = jnp.eye(m, n, dtype=jnp.float32)                       # (m, n)
    add = jnp.diag(jnp.concatenate([jnp.zeros((n,), jnp.float32),
                                    jnp.ones((m - n,), jnp.float32)]))  # (m, m)

    out = jax.jit(spd_increase_dim)(X, eye, add)
    out = jax.block_until_ready(out)

    # Pure-JAX reference of the module's forward.
    ref = add + jnp.einsum('ab,...bc,dc->...ad', eye, X, eye)
    np.testing.assert_allclose(np.asarray(out), np.asarray(ref),
                               rtol=1e-5, atol=1e-5)
    print("KERNEL_OK")
</pallas_src>

<mosaic_0001>
module attributes {stable_mosaic.version = 11 : i64} {
  func.func @_spd_increase_dim_kernel(%arg0: i32, %arg1: memref<4x16x16xf32, #tpu.memory_space<vmem>>, %arg2: memref<16x32xf32, #tpu.memory_space<vmem>>, %arg3: memref<32x32xf32, #tpu.memory_space<vmem>>, %arg4: memref<4x32x32xf32, #tpu.memory_space<vmem>>) attributes {dimension_semantics = [#tpu.dimension_semantics<parallel>], iteration_bounds = array<i64: 2>, scalar_prefetch = 0 : i64, scratch_operands = 0 : i64, tpu.core_type = #tpu.core_type<tc>, window_params = [{transform_indices = @transform_0, window_bounds = array<i64: 4, 16, 16>}, {pipeline_mode = #tpu.pipeline_mode<synchronous>, transform_indices = @transform_1, window_bounds = array<i64: 16, 32>}, {pipeline_mode = #tpu.pipeline_mode<synchronous>, transform_indices = @transform_2, window_bounds = array<i64: 32, 32>}, {transform_indices = @transform_3, window_bounds = array<i64: 4, 32, 32>}]} {
    %c0 = arith.constant 0 : index
    %c0_0 = arith.constant 0 : index
    %0 = vector.load %arg2[%c0, %c0_0] : memref<16x32xf32, #tpu.memory_space<vmem>>, vector<16x32xf32>
    %c0_1 = arith.constant 0 : index
    %c0_2 = arith.constant 0 : index
    %c0_3 = arith.constant 0 : index
    %1 = vector.load %arg1[%c0_1, %c0_2, %c0_3] : memref<4x16x16xf32, #tpu.memory_space<vmem>>, vector<4x16x16xf32>
    %2 = vector.shape_cast %1 : vector<4x16x16xf32> to vector<64x16xf32>
    %cst = arith.constant dense<0.000000e+00> : vector<64x32xf32>
    %3 = tpu.matmul %2, %0, %cst {dimension_numbers = #tpu.dot_dimension_numbers<[1], [0], [0], [1], [0, 0, 1, 1], [], []>} : vector<64x16xf32>, vector<16x32xf32>, vector<64x32xf32> -> vector<64x32xf32>
    %4 = vector.shape_cast %3 : vector<64x32xf32> to vector<4x16x32xf32>
    %5 = tpu.transpose %4, [0, 2, 1] : vector<4x16x32xf32> -> vector<4x32x16xf32>
    %6 = vector.shape_cast %5 : vector<4x32x16xf32> to vector<128x16xf32>
    %cst_4 = arith.constant dense<0.000000e+00> : vector<128x32xf32>
    %7 = tpu.matmul %6, %0, %cst_4 {dimension_numbers = #tpu.dot_dimension_numbers<[1], [0], [0], [1], [0, 0, 1, 1], [], []>} : vector<128x16xf32>, vector<16x32xf32>, vector<128x32xf32> -> vector<128x32xf32>
    %8 = vector.shape_cast %7 : vector<128x32xf32> to vector<4x32x32xf32>
    %c0_5 = arith.constant 0 : index
    %c0_6 = arith.constant 0 : index
    %9 = vector.load %arg3[%c0_5, %c0_6] : memref<32x32xf32, #tpu.memory_space<vmem>>, vector<32x32xf32>
    %10 = vector.shape_cast %9 : vector<32x32xf32> to vector<1x32x32xf32>
    %11 = vector.broadcast %10 : vector<1x32x32xf32> to vector<4x32x32xf32>
    %12 = arith.addf %8, %11 : vector<4x32x32xf32>
    %c0_7 = arith.constant 0 : index
    %c0_8 = arith.constant 0 : index
    %c0_9 = arith.constant 0 : index
    %13 = vector.load %arg4[%c0_7, %c0_8, %c0_9] : memref<4x32x32xf32, #tpu.memory_space<vmem>>, vector<4x32x32xf32>
    tpu.vector_store %arg4[%c0_7, %c0_8, %c0_9], %12 {strides = array<i32>} : memref<4x32x32xf32, #tpu.memory_space<vmem>>, vector<4x32x32xf32>,
    return
  }
  func.func @transform_0(%arg0: i32) -> (i32, i32, i32) {
    %c0_i32 = arith.constant 0 : i32
    %c0_i32_0 = arith.constant 0 : i32
    %c0_i32_1 = arith.constant 0 : i32
    return %arg0, %c0_i32, %c0_i32_0 : i32, i32, i32
  }
  func.func @transform_1(%arg0: i32) -> (i32, i32) {
    %c0_i32 = arith.constant 0 : i32
    %c0_i32_0 = arith.constant 0 : i32
    %c0_i32_1 = arith.constant 0 : i32
    return %c0_i32, %c0_i32_0 : i32, i32
  }
  func.func @transform_2(%arg0: i32) -> (i32, i32) {
    %c0_i32 = arith.constant 0 : i32
    %c0_i32_0 = arith.constant 0 : i32
    %c0_i32_1 = arith.constant 0 : i32
    return %c0_i32, %c0_i32_0 : i32, i32
  }
  func.func @transform_3(%arg0: i32) -> (i32, i32, i32) {
    %c0_i32 = arith.constant 0 : i32
    %c0_i32_0 = arith.constant 0 : i32
    %c0_i32_1 = arith.constant 0 : i32
    return %arg0, %c0_i32, %c0_i32_0 : i32, i32, i32
  }
}

</mosaic_0001>

<bundles_post_ra>
// kernel: spd_increase_dim.1
= control target key start
LH: loop header
LB: loop body
LE: loop exit
PB: predicated region body
PF: predicated region fallthrough
CT: control target
= control target key end

     0   :  { %8 = vsyncpa [#allocation3], 0  ;;  %s1517_s0 = inlined_call_operand.hbm [shape: f32[8,16,16], index: 0, kind: input, shape index: {}]   ;;  %s1518_s1 = inlined_call_operand.hbm [shape: f32[16,32], index: 1, kind: input, shape index: {}]   ;;  %s1519_s2 = inlined_call_operand.hbm [shape: f32[32,32], index: 2, kind: input, shape index: {}]   ;;  %s1520_s3 = inlined_call_operand.hbm [shape: f32[8,32,32], index: 3, kind: output, shape index: {}]  }
   0x1   :  { %10 = vsyncpa [#allocation3 + $0x1], 0 }
   0x2   :  { %11 = vsyncpa [#allocation6], 0 }
   0x3   :  { %12 = vsyncpa [#allocation4], 0 }
   0x4   :  { %14 = vsyncpa [#allocation4 + $0x1], 0  ;;  %s1214_s12 = smov 0   ;;  %s1216_s13 = smov 0  }
   0x5   :  { %s1218_s14 = smov 0   ;;  %s1220_s15 = smov 0  }
   0x6 LB: > { %s1235_s16 = sadd.s32 4294967295, %s1184_s15   ;;  %s826_s17 = sadd.s32 4294967294, %s1184_s15   ;;  %s1184_s15 = sphi %s1220_s15, %s1540_s15   ;;  %s1180_s14 = sphi %s1218_s14, %s1539_s14   ;;  %s1176_s13 = sphi %s1216_s13, %s1538_s13   ;;  %s1172_s12 = sphi %s1214_s12, %s1537_s12  }
   0x7   : > { %p40_p0 = scmp.ne.s32.totalorder %s1176_s13, %s1172_s12  ;;  %p1521_p1 = scmp.eq.s32.totalorder %s1235_s16, 0 }
   0x8   : > { %p112_p3 = scmp.eq.s32.totalorder %s826_s17, 1  ;;  %p827_p5 = scmp.ge.s32.totalorder %s1184_s15, 1 }
   0x9   : > { %p1244_p4 = por %p1521_p1, %p40_p0  ;;  %p119_p7 = scmp.lt.s32.totalorder %s1184_s15, 3 }
   0xa   : > { %p1249_p6 = por %p112_p3, %p40_p0  ;;  %s1186_s21 = smov [#allocation5]  }
   0xb   : > { %s1524_s18 = scalar_select %p1244_p4, 1, 0 }
   0xc   : > { %s1525_s19 = scalar_select %p1249_p6, 1, 0 }
   0xd   : > { %p1254_p8 = pnand %p827_p5, %p119_p7  ;;  %s131_s22 = sshll.u32 %s1186_s21, 4  ;;  %s1258_s22 = int_to_ptr.vmem [resolvable:$true] %s131_s22 }
   0xe   : > { %s1187_s24 = smov [#allocation7]   ;;  %s1028_s28 = scalar_lea.hbm %s1518_s1, 256 }
   0xf   : > { %p968_p9 = pneg %p1254_p8  ;;  %s144_s25 = sshll.u32 %s1187_s24, 4  ;;  %s1269_s25 = int_to_ptr.vmem [resolvable:$true] %s144_s25 }
  0x10   : > { %p1029_p12 = scmp.ne.s32.totalorder %s1518_s1, %s1028_s28  ;;  %p1035_p5 = scmp.lt.u32.totalorder %s1028_s28, %s1518_s1 }
  0x11   : > { %p1265_p11 = pnand %p968_p9, %p1521_p1 }
  0x13   : > { %p1030_p13 = pneg %p1265_p11 }
  0x15   : > { %p1031_p0 = pnand %p1030_p13, %p1029_p12 }
  0x17   : > { %p1032_p3 = pneg %p1031_p0 }
  0x19   : > { %p1037_p7 = pnand %p1035_p5, %p1032_p3 }
  0x1b   : > { %1040 = shalt.err (!%p1037_p7)
}
  0x1c   : > { %s1041_s6 = scalar_lea.vmem %s1258_s22, 256  ;;  %p1049_p2 = scmp.lt.s32.totalorder %s1258_s22, %s1258_s22 }
  0x1d   : > { %p1042_p9 = scmp.ne.s32.totalorder %s1258_s22, %s1041_s6  ;;  %p1050_p12 = scmp.lt.s32.totalorder %s1041_s6, %s1041_s6 }
  0x1f   : > { %p1044_p10 = pnand %p1042_p9, %p1030_p13  ;;  %p1051_p0 = por %p1050_p12, %p1049_p2 }
  0x21   : > { %p1045_p1 = pneg %p1044_p10 }
  0x23   : > { %p1052_p6 = pnand %p1051_p0, %p1045_p1 }
  0x25   : > { %1055 = shalt.err (!%p1052_p6)
}
  0x26   : > { %s1188_s7 = smov 128   ;;  %s1189_s8 = smov 8  }
  0x27   : > { %971 = dma.hbm_to_vmem [thread:$0]  (!%p1265_p11), %s1518_s1, 256, %s1258_s22, [#allocation6], %s1188_s7, %s1188_s7, %s1189_s8  }
  0x28   : > { %s1056_s21 = scalar_lea.hbm %s1519_s2, 512 }
  0x29   : > { %p1057_p1 = scmp.ne.s32.totalorder %s1519_s2, %s1056_s21  ;;  %p1063_p10 = scmp.lt.u32.totalorder %s1056_s21, %s1519_s2 }
  0x2b   : > { %p1059_p2 = pnand %p1057_p1, %p1030_p13 }
  0x2d   : > { %p1060_p6 = pneg %p1059_p2 }
  0x2f   : > { %p1065_p3 = pnand %p1063_p10, %p1060_p6 }
  0x31   : > { %1068 = shalt.err (!%p1065_p3)
}
  0x32   : > { %s1069_s22 = scalar_lea.vmem %s1269_s25, 512  ;;  %p1077_p12 = scmp.lt.s32.totalorder %s1269_s25, %s1269_s25 }
  0x33   : > { %p1070_p5 = scmp.ne.s32.totalorder %s1269_s25, %s1069_s22  ;;  %p1078_p0 = scmp.lt.s32.totalorder %s1069_s22, %s1069_s22 }
  0x35   : > { %p1072_p7 = pnand %p1070_p5, %p1030_p13  ;;  %p1079_p1 = por %p1078_p0, %p1077_p12 }
  0x37   : > { %p1073_p9 = pneg %p1072_p7 }
  0x39   : > { %p1080_p2 = pnand %p1079_p1, %p1073_p9 }
  0x3b   : > { %1083 = shalt.err (!%p1080_p2)
}
  0x3c   : > { %974 = dma.hbm_to_vmem [thread:$0]  (!%p1265_p11), %s1519_s2, 512, %s1269_s25, [#allocation6], %s1188_s7, %s1188_s7, %s1189_s8  }
  0x3d   : > { %s1330_s23 = sadd.s32 1, %s1184_s15   ;;  %s27_s4 = sadd.s32 1, %s1180_s14 }
  0x3e   : > { %s24_s5 = ssub.s32 %s1184_s15, %s1330_s23  ;;  %p34_p13 = scmp.ne.s32.totalorder %s1180_s14, %s1176_s13 }
  0x3f   : > { %p25_p6 = scmp.eq.s32.totalorder %s24_s5, 0  ;;  %p35_p10 = scmp.eq.s32.totalorder %s1184_s15, 0 }
  0x40   : > { %p1528_p3 = scmp.eq.s32.totalorder %s1235_s16, 1  ;;  %p985_p7 = scmp.lt.s32.totalorder %s1184_s15, 2 }
  0x41   : > { %s1346_s9 = scalar_select %p25_p6, %s1180_s14, %s27_s4  }
  0x42   : > { %p1340_p5 = por %p1528_p3, %p34_p13  ;;  %p36_p9 = por %p35_p10, %p34_p13 }
  0x43   : > { %s158_s10 = sand.u32 1, %s1180_s14   ;;  %s871_s25 = sshll.u32 %s1184_s15, 10 }
  0x44   : > { %s1529_s6 = scalar_select %p1340_p5, 1, 0 }
  0x45   : > { %s831_s11 = sshll.u32 %s158_s10, 6  ;;  %s1353_s24 = scalar_lea.hbm %s1517_s0, %s871_s25 }
  0x46   : > { %s162_s26 = scalar_lea.vmem [#allocation2], %s831_s11  ;;  %p1357_p11 = pnand %p985_p7, %p36_p9 }
  0x47   : > { %s170_s27 = sshll.u32 %s162_s26, 4  ;;  %s1361_s22 = scalar_lea.sflag [#allocation3], %s158_s10  ;;  %s1355_s27 = int_to_ptr.vmem [resolvable:$true] %s170_s27 }
  0x48   : > { %s1084_s29 = scalar_lea.hbm %s1353_s24, 1024  ;;  %p1086_p0 = pneg %p1357_p11 }
  0x49   : > { %p1085_p12 = scmp.ne.s32.totalorder %s1353_s24, %s1084_s29  ;;  %s1089_s5 = scalar_lea.hbm %s1517_s0, 2048 }
  0x4a   : > { %p1090_p13 = scmp.lt.u32.totalorder %s1353_s24, %s1517_s0  ;;  %p1091_p6 = scmp.lt.u32.totalorder %s1089_s5, %s1084_s29 }
  0x4b   : > { %p1087_p1 = pnand %p1086_p0, %p1085_p12  ;;  %p1093_p3 = scmp.lt.u32.totalorder %s1084_s29, %s1353_s24 }
  0x4c   : > { %p1092_p10 = por %p1091_p6, %p1090_p13 }
  0x4d   : > { %p1088_p2 = pneg %p1087_p1 }
  0x4e   : > { %p1094_p7 = por %p1093_p3, %p1092_p10 }
  0x50   : > { %p1095_p9 = pnand %p1094_p7, %p1088_p2 }
  0x52   : > { %1098 = shalt.err (!%p1095_p9)
}
  0x53   : > { %s1099_s10 = scalar_lea.vmem %s1355_s27, 1024  ;;  %s1190_s17 = smov [#allocation2]  }
  0x54   : > { %p1100_p12 = scmp.ne.s32.totalorder %s1355_s27, %s1099_s10  ;;  %s1104_s21 = sshll.u32 %s1190_s17, 4  ;;  %s1105_s21 = int_to_ptr.vmem [resolvable:$false] %s1104_s21 }
  0x55   : > { %s1106_s26 = scalar_lea.vmem %s1105_s21, 2048  ;;  %p1107_p4 = scmp.lt.s32.totalorder %s1355_s27, %s1105_s21 }
  0x56   : > { %p1102_p1 = pnand %p1100_p12, %p1086_p0  ;;  %p1108_p13 = scmp.lt.s32.totalorder %s1106_s26, %s1099_s10 }
  0x58   : > { %p1103_p5 = pneg %p1102_p1  ;;  %p1109_p6 = por %p1108_p13, %p1107_p4 }
  0x5a   : > { %p1110_p10 = pnand %p1109_p6, %p1103_p5 }
  0x5c   : > { %1113 = shalt.err (!%p1110_p10)
}
  0x5d   : > { %978 = dma.hbm_to_vmem [thread:$0]  (!%p1357_p11), %s1353_s24, 1024, %s1355_s27, %s1361_s22, %s1188_s7, %s1188_s7, %s1189_s8  }
  0x5e   : > { %182 = sbr.rel (%p1254_p8) target bundleno = 720 (0x2d0), region = 32  ;;  %s1395_s29 = sand.u32 (!%p1254_p8), 1, %s1176_s13  }
  0x5f   : > { %s836_s30 = sshll.u32 (!%p1254_p8), %s1395_s29, 6  ;;  %s185_s4 = scalar_lea.sflag (!%p1254_p8), [#allocation3], %s1395_s29 }
  0x60   : > { %s188_s5 = scalar_lea.vmem (!%p1254_p8), [#allocation2], %s836_s30  ;;  %p1531_p4 = scmp.ne.s32.totalorder (!%p1254_p8), %s1524_s18, 0 }
  0x65   : > { %1159 = dma.done.wait (%p1531_p4), %s185_s4, 1024  }
  0x66   : > { %1161 = vsyncadd (%p1531_p4), %s185_s4, 4294966272  ;;  %p1532_p5 = scmp.eq.s32.totalorder %s1235_s16, 0 }
  0x68   : > { %1163 = dma.done.wait (%p1532_p5), [#allocation6], 768   ;;  %p1533_p11 = pmov %p1532_p5 }
  0x69   : > { %vm231_vm0 = vcmask 130048   ;;  %v221_v0 = vld [vmem:[#allocation5] sm:$0xff]  ;;  %v222_v1 = vld [vmem:[#allocation5 + $0x8] sm:$0xff]  ;;  %v225_v5 = vld [vmem:[%s188_s5 + $0x10] sm:$0xff]  ;;  %s839_s18 = sshll.u32 %s1395_s29, 7  ;;  %vm702_vm1 = vcmask 261120  }
  0x6a   : > { %1165 = vsyncadd (%p1533_p11), [#allocation6], 4294966528  ;;  %v223_v2 = vld [vmem:[%s188_s5] sm:$0xff]  ;;  %v946_v3 = vpack.c.bf16 %v222_v1, %v221_v0  ;;  %v224_v4 = vld [vmem:[%s188_s5 + $0x8] sm:$0xff]  ;;  %s1432_s20 = scalar_lea.vmem [#allocation8], %s839_s18  ;;  %s873_s7 = sshll.u32 %s1235_s16, 11 }
  0x6b   : > { %906 = vmatprep.mubr.msk.f32.mxu0 %vm231_vm0, %v223_v2  ;;  %v226_v6 = vld [vmem:[%s188_s5 + $0x18] sm:$0xff]  ;;  %v227_v7 = vld [vmem:[%s188_s5 + $0x20] sm:$0xff]  ;;  %v228_v8 = vld [vmem:[%s188_s5 + $0x28] sm:$0xff]  ;;  %s734_s8 = sshll.u32 %s1432_s20, 4  ;;  %s1467_s28 = scalar_lea.hbm %s1520_s3, %s873_s7  ;;  %s1469_s8 = int_to_ptr.vmem [resolvable:$true] %s734_s8 }
  0x6c   : > { %947 = vmatprep.subr.bf16.mxu0 %v946_v3  ;;  %954 = vmatprep.subr.bf16.mxu1 %v946_v3  ;;  %v229_v9 = vld [vmem:[%s188_s5 + $0x30] sm:$0xff]  ;;  %v230_v10 = vld [vmem:[%s188_s5 + $0x38] sm:$0xff]  ;;  %v685_v41 = vld [vmem:[#allocation7 + $0x18] sm:$0xff]  ;;  %s720_s16 = scalar_lea.sflag [#allocation4], %s1395_s29  ;;  %s1114_s22 = scalar_lea.vmem %s1469_s8, 2048 }
  0x6d   : > { %949 = vmatpush3.bf16.msra.mxu0 %v946_v3  ;;  %955 = vmatpush3.bf16.msra.mxu1 %v946_v3  ;;  %v683_v35 = vld [vmem:[#allocation7 + $0x8] sm:$0xff]  ;;  %v682_v36 = vld [vmem:[#allocation7] sm:$0xff]  ;;  %v684_v42 = vld [vmem:[#allocation7 + $0x10] sm:$0xff]  ;;  %p1115_p8 = scmp.ne.s32.totalorder %s1469_s8, %s1114_s22  ;;  %p1534_p0 = scmp.ne.s32.totalorder %s1529_s6, 0 }
  0x6e   : > { %951 = vmatprep.subr.bf16.mxu0 %v946_v3  ;;  %s1191_s11 = smov [#allocation8]  }
  0x6f   : > { %p1116_p2 = pnand %p1115_p8, %p1534_p0  ;;  %s1118_s25 = sshll.u32 %s1191_s11, 4  ;;  %s1119_s25 = int_to_ptr.vmem [resolvable:$false] %s1118_s25 }
  0x70   : > { %907 = vmatmul.mubr.msk.f32.vlgmr.msra.gmra.mrb[0].mxu0 %vm231_vm0, %v224_v4  ;;  %s1120_s10 = scalar_lea.vmem %s1119_s25, 4096  ;;  %p1121_p7 = scmp.lt.s32.totalorder %s1469_s8, %s1119_s25 }
  0x71   : > { %909 = vmatprep.mubr.msk.f32.mxu0 %vm231_vm0, %v225_v5  ;;  %953 = vmatpush3.bf16.msra.mxu0 %v946_v3  ;;  %p1117_p3 = pneg %p1116_p2  ;;  %p1122_p9 = scmp.lt.s32.totalorder %s1120_s10, %s1114_s22 }
  0x73   : > { %p1123_p12 = por %p1122_p9, %p1121_p7 }
  0x74   : > { %910 = vmatmul.mubr.msk.f32.gmra.mrb[2].mxu0 %vm231_vm0, %v226_v6 }
  0x75   : > { %912 = vmatprep.mubr.msk.f32.mxu0 %vm231_vm0, %v227_v7  ;;  %p1124_p1 = pnand %p1123_p12, %p1117_p3 }
  0x78   : > { %913 = vmatmul.mubr.msk.f32.gmra.mrb[4].mxu0 %vm231_vm0, %v228_v8 }
  0x79   : > { %915 = vmatprep.mubr.msk.f32.mxu0 %vm231_vm0, %v229_v9 }
  0x7c   : > { %916 = vmatmul.mubr.msk.f32.gmra.mrb[6].mxu0 %vm231_vm0, %v230_v10 }
 0x143   : > { %v908_v11 = vpop.f32.mrb[0].mxu0 }
 0x144   : > { %v322_v12 = vpop.f32.mrb[1].mxu0 }
 0x147   : > { %v911_v13 = vpop.f32.mrb[2].mxu0 }
 0x148   : > { %v332_v14 = vpop.f32.mrb[3].mxu0 }
 0x149   : > { %393 = vxpose.xlu0.b32.start [1/2] (short) (narrow) %v332_v14, 32 }
 0x14b   : > { %v914_v15 = vpop.f32.mrb[4].mxu0 }
 0x14c   : > { %v342_v16 = vpop.f32.mrb[5].mxu0 }
 0x14d   : > { %394 = vxpose.xlu0.b32.end [2/2] (short) (narrow) %v911_v13, 32  ;;  %425 = vxpose.xlu1.b32.start [1/2] (short) (narrow) %v342_v16, 32 }
 0x14f   : > { %v917_v17 = vpop.f32.mrb[6].mxu0 }
 0x150   : > { %v352_v18 = vpop.f32.mrb[7].mxu0 }
 0x151   : > { %426 = vxpose.xlu1.b32.end [2/2] (short) (narrow) %v914_v15, 32 }
 0x156   : > { %361 = vxpose.xlu0.b32.start [1/2] (short) (narrow) %v322_v12, 32 }
 0x15a   : > { %362 = vxpose.xlu0.b32.end [2/2] (short) (narrow) %v908_v11, 32  ;;  %457 = vxpose.xlu1.b32.start [1/2] (short) (narrow) %v352_v18, 32 }
 0x15e   : > { %458 = vxpose.xlu1.b32.end [2/2] (short) (narrow) %v917_v17, 32 }
 0x1c9   : > { %v409_v19 = vpop.trf.xlu0 }
 0x1ca   : > { %928 = vmatprep.mubr.msk.f32.mxu1 %vm231_vm0, %v409_v19 }
 0x1cd   : > { %v410_v20 = vpop.trf.xlu0  ;;  %v441_v21 = vpop.trf.xlu1 }
 0x1ce   : > { %929 = vmatmul.mubr.msk.f32.vlgmr.msra.gmra.mrb[0].mxu1 %vm231_vm0, %v410_v20 }
 0x1d1   : > { %v411_v22 = vpop.trf.xlu0  ;;  %v442_v23 = vpop.trf.xlu1 }
 0x1d2   : > { %931 = vmatprep.mubr.msk.f32.mxu1 %vm231_vm0, %v411_v22 }
 0x1d5   : > { %v412_v24 = vpop.trf.xlu0  ;;  %v443_v25 = vpop.trf.xlu1 }
 0x1d6   : > { %932 = vmatmul.mubr.msk.f32.gmra.mrb[2].mxu1 %vm231_vm0, %v412_v24 }
 0x1d7   : > { %934 = vmatprep.mubr.msk.f32.mxu1 %vm231_vm0, %v441_v21 }
 0x1d9   : > { %v444_v26 = vpop.trf.xlu1  ;;  %v377_v27 = vpop.trf.xlu0 }
 0x1da   : > { %935 = vmatmul.mubr.msk.f32.gmra.mrb[4].mxu1 %vm231_vm0, %v442_v23  ;;  %922 = vmatprep.mubr.msk.f32.mxu0 %vm231_vm0, %v377_v27 }
 0x1db   : > { %937 = vmatprep.mubr.msk.f32.mxu1 %vm231_vm0, %v443_v25 }
 0x1dd   : > { %v473_v28 = vpop.trf.xlu1  ;;  %v378_v29 = vpop.trf.xlu0 }
 0x1de   : > { %938 = vmatmul.mubr.msk.f32.gmra.mrb[6].mxu1 %vm231_vm0, %v444_v26  ;;  %923 = vmatmul.mubr.msk.f32.vlgmr.msra.gmra.mrb[8].mxu0 %vm231_vm0, %v378_v29 }
 0x1df   : > { %940 = vmatprep.mubr.msk.f32.mxu1 %vm231_vm0, %v473_v28 }
 0x1e1   : > { %v474_v30 = vpop.trf.xlu1  ;;  %v379_v31 = vpop.trf.xlu0 }
 0x1e2   : > { %941 = vmatmul.mubr.msk.f32.gmra.mrb[8].mxu1 %vm231_vm0, %v474_v30  ;;  %925 = vmatprep.mubr.msk.f32.mxu0 %vm231_vm0, %v379_v31 }
 0x1e5   : > { %v475_v32 = vpop.trf.xlu1  ;;  %v380_v33 = vpop.trf.xlu0 }
 0x1e6   : > { %943 = vmatprep.mubr.msk.f32.mxu1 %vm231_vm0, %v475_v32  ;;  %926 = vmatmul.mubr.msk.f32.gmra.mrb[10].mxu0 %vm231_vm0, %v380_v33 }
 0x1e9   : > { %v476_v34 = vpop.trf.xlu1 }
 0x1ea   : > { %944 = vmatmul.mubr.msk.f32.gmra.mrb[10].mxu1 %vm231_vm0, %v476_v34 }
 0x2a1   : > { %v930_v37 = vpop.f32.mrb[0].mxu1 }
 0x2a2   : > { %v691_v38 = vadd.f32 %v930_v37, %v683_v35  ;;  %v623_v39 = vpop.f32.mrb[1].mxu1 }
 0x2a3   : > { %v690_v40 = vadd.f32 %v682_v36, %v623_v39 }
 0x2a4   : > { %708 = vst.msk [vmem:[%s1432_s20 + $0x28] sm:$0xff] %vm702_vm1, %v691_v38 }
 0x2a5   : > { %707 = vst.msk [vmem:[%s1432_s20 + $0x20] sm:$0xff] %vm702_vm1, %v690_v40 }
 0x2a9   : > { %v933_v43 = vpop.f32.mrb[2].mxu1 }
 0x2aa   : > { %v693_v44 = vadd.f32 %v933_v43, %v685_v41  ;;  %v633_v45 = vpop.f32.mrb[3].mxu1 }
 0x2ab   : > { %v692_v46 = vadd.f32 %v684_v42, %v633_v45 }
 0x2ac   : > { %710 = vst.msk [vmem:[%s1432_s20 + $0x38] sm:$0xff] %vm702_vm1, %v693_v44 }
 0x2ad   : > { %709 = vst.msk [vmem:[%s1432_s20 + $0x30] sm:$0xff] %vm702_vm1, %v692_v46  ;;  %v936_v47 = vpop.f32.mrb[4].mxu1 }
 0x2ae   : > { %v695_v48 = vadd.f32 %v936_v47, %v683_v35  ;;  %v643_v49 = vpop.f32.mrb[5].mxu1 }
 0x2af   : > { %v694_v50 = vadd.f32 %v682_v36, %v643_v49 }
 0x2b0   : > { %712 = vst.msk [vmem:[%s1432_s20 + $0x48] sm:$0xff] %vm702_vm1, %v695_v48 }
 0x2b1   : > { %711 = vst.msk [vmem:[%s1432_s20 + $0x40] sm:$0xff] %vm702_vm1, %v694_v50  ;;  %v939_v51 = vpop.f32.mrb[6].mxu1  ;;  %v924_v52 = vpop.f32.mrb[8].mxu0 }
 0x2b2   : > { %v697_v53 = vadd.f32 %v939_v51, %v685_v41  ;;  %v653_v54 = vpop.f32.mrb[7].mxu1  ;;  %v687_v55 = vadd.f32 %v924_v52, %v683_v35  ;;  %v603_v56 = vpop.f32.mrb[9].mxu0 }
 0x2b3   : > { %v696_v57 = vadd.f32 %v684_v42, %v653_v54  ;;  %v686_v58 = vadd.f32 %v682_v36, %v603_v56 }
 0x2b4   : > { %714 = vst.msk [vmem:[%s1432_s20 + $0x58] sm:$0xff] %vm702_vm1, %v697_v53  ;;  %704 = vst.msk [vmem:[%s1432_s20 + $0x8] sm:$0xff] %vm702_vm1, %v687_v55 }
 0x2b5   : > { %713 = vst.msk [vmem:[%s1432_s20 + $0x50] sm:$0xff] %vm702_vm1, %v696_v57  ;;  %703 = vst.msk [vmem:[%s1432_s20] sm:$0xff] %vm702_vm1, %v686_v58  ;;  %v942_v59 = vpop.f32.mrb[8].mxu1 }
 0x2b6   : > { %v699_v60 = vadd.f32 %v942_v59, %v683_v35  ;;  %v663_v61 = vpop.f32.mrb[9].mxu1 }
 0x2b7   : > { %v698_v62 = vadd.f32 %v682_v36, %v663_v61 }
 0x2b8   : > { %716 = vst.msk [vmem:[%s1432_s20 + $0x68] sm:$0xff] %vm702_vm1, %v699_v60 }
 0x2b9   : > { %715 = vst.msk [vmem:[%s1432_s20 + $0x60] sm:$0xff] %vm702_vm1, %v698_v62  ;;  %v927_v63 = vpop.f32.mrb[10].mxu0 }
 0x2ba   : > { %v689_v0 = vadd.f32 %v927_v63, %v685_v41  ;;  %v613_v1 = vpop.f32.mrb[11].mxu0 }
 0x2bb   : > { %v688_v2 = vadd.f32 %v684_v42, %v613_v1 }
 0x2bc   : > { %706 = vst.msk [vmem:[%s1432_s20 + $0x18] sm:$0xff] %vm702_vm1, %v689_v0 }
 0x2bd   : > { %705 = vst.msk [vmem:[%s1432_s20 + $0x10] sm:$0xff] %vm702_vm1, %v688_v2  ;;  %v945_v3 = vpop.f32.mrb[10].mxu1 }
 0x2be   : > { %v701_v4 = vadd.f32 %v945_v3, %v685_v41  ;;  %v673_v5 = vpop.f32.mrb[11].mxu1 }
 0x2bf   : > { %v700_v6 = vadd.f32 %v684_v42, %v673_v5 }
 0x2c0   : > { %718 = vst.msk [vmem:[%s1432_s20 + $0x78] sm:$0xff] %vm702_vm1, %v701_v4 }
 0x2c1   : > { %717 = vst.msk [vmem:[%s1432_s20 + $0x70] sm:$0xff] %vm702_vm1, %v700_v6 }
 0x2c2   : > { %1127 = shalt.err (!%p1124_p1)
}
 0x2c3   : > { %s1128_s17 = scalar_lea.hbm %s1467_s28, 2048  ;;  %s1132_s30 = scalar_lea.hbm %s1520_s3, 4096 }
 0x2c4   : > { %p1129_p13 = scmp.ne.s32.totalorder %s1467_s28, %s1128_s17  ;;  %p1133_p4 = scmp.lt.u32.totalorder %s1467_s28, %s1520_s3 }
 0x2c5   : > { %p1134_p5 = scmp.lt.u32.totalorder %s1132_s30, %s1128_s17  ;;  %p1136_p8 = scmp.lt.u32.totalorder %s1128_s17, %s1467_s28 }
 0x2c6   : > { %p1130_p6 = pnand %p1129_p13, %p1534_p0 }
 0x2c7   : > { %p1135_p11 = por %p1134_p5, %p1133_p4 }
 0x2c8   : > { %p1131_p10 = pneg %p1130_p6 }
 0x2c9   : > { %p1137_p2 = por %p1136_p8, %p1135_p11 }
 0x2cb   : > { %p1138_p3 = pnand %p1137_p2, %p1131_p10 }
 0x2cd   : > { %1141 = shalt.err (!%p1138_p3)
}
 0x2ce   : > { %s1192_s18 = smov 128   ;;  %s1193_s20 = smov 8  }
 0x2cf   : > { %966 = dma.vmem_to_hbm [thread:$0]  (%p1534_p0), %s1469_s8, 2048, %s1467_s28, %s720_s16, %s1192_s18, %s1192_s18, %s1193_s20  }
 0x2d0 PF: > { %s749_s7 = sand.u32 1, %s1172_s12   ;;  %p1535_p7 = scmp.ne.s32.totalorder %s1525_s19, 0 }
 0x2d1   : > { %p1536_p9 = scmp.ge.s32.totalorder %s1184_s15, 2  ;;  %s750_s24 = scalar_lea.sflag [#allocation4], %s749_s7 }
 0x2d3   : > { %p980_p12 = pnand %p1536_p9, %p1535_p7 }
 0x2d5   : > { %1167 = dma.done.wait (!%p980_p12), %s750_s24, 2048  }
 0x2d6   : > { %1169 = vsyncadd (!%p980_p12), %s750_s24, 4294965248  ;;  %p17_p1 = scmp.ge.s32.totalorder %s1330_s23, 4   ;;  %s1537_s12 = smov %s1176_s13 }
 0x2d7   : > { %s1538_s13 = smov %s1180_s14  ;;  %s1539_s14 = smov %s1346_s9 }
 0x2d8   : > { %s1540_s15 = smov %s1330_s23  ;;  %19 = sbr.rel (!%p17_p1) target bundleno = 6 (0x6), region = 85 }
 0x2df   :  { %755 = vsyncpa [#allocation3], 1 }
 0x2e0   :  { %757 = vsyncpa [#allocation3 + $0x1], 1 }
 0x2e1   :  { %758 = vsyncpa [#allocation6], 1 }
 0x2e2   :  { %759 = vsyncpa [#allocation4], 1 }
 0x2e3   :  { %761 = vsyncpa [#allocation4 + $0x1], 1 }

</bundles_post_ra>
